<compile_context>
chip_gen: v5e
topology: v5e:2x2
jax: 0.10.0
libtpu: 0.0.40
codegen_flags: <defaults>
</compile_context>

<pallas_src>
import functools
import math

import jax
import jax.numpy as jnp
from jax import lax
from jax.experimental import pallas as pl
from jax.experimental.pallas import tpu as pltpu


# ---------------------------------------------------------------------------
# Buffer construction (plain JAX glue) — mirrors nn.Module.__init__
# ---------------------------------------------------------------------------
def build_pe(d_model: int, max_len: int = 5000) -> jnp.ndarray:
    position = jnp.arange(0, max_len, dtype=jnp.float32)[:, None]            # (max_len, 1)
    div_term = jnp.exp(jnp.arange(0, d_model, 2, dtype=jnp.float32)
                       * (-math.log(10000.0) / d_model))                     # (d_model/2,)
    pe = jnp.zeros((max_len, d_model), dtype=jnp.float32)
    pe = pe.at[:, 0::2].set(jnp.sin(position * div_term))
    pe = pe.at[:, 1::2].set(jnp.cos(position * div_term))
    # pe.unsqueeze(0).transpose(0, 1) -> (max_len, 1, d_model)
    return pe[:, None, :]


# ---------------------------------------------------------------------------
# In-kernel counter-based PRNG helpers (portable: plain int32 VPU ops)
# ---------------------------------------------------------------------------
def _i32(c: int) -> jnp.int32:
    """Reinterpret a 32-bit unsigned constant as a signed int32 literal."""
    c &= 0xFFFFFFFF
    return jnp.int32(c - (1 << 32) if c >= (1 << 31) else c)


def _mix32(x):
    """lowbias32 integer mixer; wrapping int32 arithmetic, logical shifts."""
    def lsr(v, k):
        return lax.shift_right_logical(v, jnp.full(v.shape, k, jnp.int32))
    x = x ^ lsr(x, 16)
    x = x * _i32(0x7FEB352D)
    x = x ^ lsr(x, 15)
    x = x * _i32(0x846CA68B)
    x = x ^ lsr(x, 16)
    return x


# ---------------------------------------------------------------------------
# Pallas kernels
# ---------------------------------------------------------------------------
def _pe_add_kernel(x_ref, pe_ref, o_ref):
    # x_ref: (TS, B, D), pe_ref: (TS, 1, D) — sublane broadcast over batch on the VPU.
    o_ref[...] = (x_ref[...] + pe_ref[...]).astype(o_ref.dtype)


def _pe_add_dropout_kernel(seed_ref, x_ref, pe_ref, o_ref, *,
                           p: float, block_rows: int, batch: int, d_model: int):
    # Fused broadcast-add + inverted dropout (scale kept elements by 1/(1-p)).
    y = x_ref[...] + pe_ref[...]                                  # (TS, B, D) f32

    # Global element index (independent of the tiling) -> per-element hash.
    shape = y.shape
    s_idx = lax.broadcasted_iota(jnp.int32, shape, 0) + pl.program_id(0) * block_rows
    b_idx = lax.broadcasted_iota(jnp.int32, shape, 1)
    d_idx = lax.broadcasted_iota(jnp.int32, shape, 2)
    lin = (s_idx * batch + b_idx) * d_model + d_idx
    h = _mix32(lin ^ (seed_ref[0] * _i32(0x9E3779B9)))

    # Keep with probability (1 - p): integer threshold compare on the top 31 bits.
    r31 = lax.shift_right_logical(h, jnp.full(shape, 1, jnp.int32))   # uniform [0, 2^31)
    thresh = jnp.int32(min(int(round(p * (1 << 31))), (1 << 31) - 1))
    keep = r31 >= thresh
    scale = 1.0 / (1.0 - p)
    o_ref[...] = jnp.where(keep, y * scale, 0.0).astype(o_ref.dtype)


# ---------------------------------------------------------------------------
# Wrapper (nn.Module.forward equivalent)
# ---------------------------------------------------------------------------
def _row_tile(S: int, B: int, D: int, itemsize: int,
              target_bytes: int = 2 * 1024 * 1024) -> int:
    """Sequence rows per block: ~target_bytes per x tile, multiple of 8, >= 8."""
    rows = max(8, target_bytes // max(1, B * D * itemsize))
    rows = min(rows, ((S + 7) // 8) * 8)
    return max(8, (rows // 8) * 8)


def positional_encoding(x, pe, *, dropout_p: float = 0.1,
                        training: bool = False, seed: int = 0):
    """x: (S, B, D); pe: (max_len, 1, D) with max_len >= S."""
    S, B, D = x.shape
    max_len = pe.shape[0]
    assert pe.shape == (max_len, 1, D) and max_len >= S

    ts = _row_tile(S, B, D, x.dtype.itemsize)
    grid = (pl.cdiv(S, ts),)

    # index_maps accept an optional trailing scalar-prefetch ref via *_ so the same
    # specs serve both the eval (0 prefetch) and dropout (1 prefetch) paths.
    x_spec = pl.BlockSpec((ts, B, D), lambda i, *_: (i, 0, 0))
    pe_spec = pl.BlockSpec((ts, 1, D), lambda i, *_: (i, 0, 0))   # windows into full pe
    o_spec = pl.BlockSpec((ts, B, D), lambda i, *_: (i, 0, 0))
    cparams = pltpu.CompilerParams(
        dimension_semantics=("parallel",),        # no reduction axis; megacore-shardable
        vmem_limit_bytes=32 * 1024 * 1024,        # fits v5e/v6e/v7x scoped budgets
    )
    out_shape = jax.ShapeDtypeStruct((S, B, D), x.dtype)

    if (not training) or dropout_p == 0.0:
        return pl.pallas_call(
            _pe_add_kernel,
            out_shape=out_shape,
            grid_spec=pltpu.PrefetchScalarGridSpec(
                num_scalar_prefetch=0, grid=grid,
                in_specs=[x_spec, pe_spec], out_specs=o_spec),
            compiler_params=cparams,
        )(x, pe)

    kernel = functools.partial(
        _pe_add_dropout_kernel,
        p=float(dropout_p), block_rows=ts, batch=B, d_model=D)
    seed_arr = jnp.asarray([seed], dtype=jnp.int32)
    return pl.pallas_call(
        kernel,
        out_shape=out_shape,
        grid_spec=pltpu.PrefetchScalarGridSpec(
            num_scalar_prefetch=1, grid=grid,
            in_specs=[x_spec, pe_spec], out_specs=o_spec),
        compiler_params=cparams,
    )(seed_arr, x, pe)


# ---------------------------------------------------------------------------
# Main
# ---------------------------------------------------------------------------
if __name__ == "__main__":
    S, B, D = 8, 2, 32          # seq_len, batch, d_model
    MAX_LEN = 64                # small max_len for the synthetic buffer

    key = jax.random.PRNGKey(0)
    x = jax.random.normal(key, (S, B, D), dtype=jnp.float32)
    pe = build_pe(D, max_len=MAX_LEN)

    # Eval-mode forward (dropout is identity) — verified against a pure-JAX ref.
    out_eval = jax.block_until_ready(positional_encoding(x, pe, training=False))
    ref = x + pe[:S]
    assert out_eval.shape == (S, B, D)
    assert jnp.allclose(out_eval, ref, atol=1e-6), "eval-mode mismatch"

    # Training-mode forward (fused add + inverted dropout with in-kernel hash PRNG).
    p = 0.1
    out_train = jax.block_until_ready(
        positional_encoding(x, pe, dropout_p=p, training=True, seed=1234))
    assert out_train.shape == (S, B, D)
    kept_val = ref / (1.0 - p)
    valid = (jnp.isclose(out_train, 0.0, atol=1e-6)
             | jnp.isclose(out_train, kept_val, rtol=1e-5, atol=1e-5))
    assert bool(jnp.all(valid)), "train-mode values must be 0 or (x+pe)/(1-p)"
    n_drop = int(jnp.sum(jnp.isclose(out_train, 0.0, atol=1e-6)
                         & ~jnp.isclose(kept_val, 0.0, atol=1e-6)))
    assert 0 < n_drop < x.size, "dropout mask is degenerate"

    print("KERNEL_OK")
</pallas_src>

<mosaic_0001>
module attributes {stable_mosaic.version = 11 : i64} {
  func.func @_pe_add_kernel(%arg0: i32, %arg1: memref<8x2x32xf32, #tpu.memory_space<vmem>>, %arg2: memref<8x1x32xf32, #tpu.memory_space<vmem>>, %arg3: memref<8x2x32xf32, #tpu.memory_space<vmem>>) attributes {dimension_semantics = [#tpu.dimension_semantics<parallel>], iteration_bounds = array<i64: 1>, scalar_prefetch = 0 : i64, scratch_operands = 0 : i64, tpu.core_type = #tpu.core_type<tc>, window_params = [{transform_indices = @transform_0, window_bounds = array<i64: 8, 2, 32>}, {transform_indices = @transform_1, window_bounds = array<i64: 8, 1, 32>}, {transform_indices = @transform_2, window_bounds = array<i64: 8, 2, 32>}]} {
    %c0 = arith.constant 0 : index
    %c0_0 = arith.constant 0 : index
    %c0_1 = arith.constant 0 : index
    %0 = vector.load %arg1[%c0, %c0_0, %c0_1] : memref<8x2x32xf32, #tpu.memory_space<vmem>>, vector<8x2x32xf32>
    %c0_2 = arith.constant 0 : index
    %c0_3 = arith.constant 0 : index
    %c0_4 = arith.constant 0 : index
    %1 = vector.load %arg2[%c0_2, %c0_3, %c0_4] : memref<8x1x32xf32, #tpu.memory_space<vmem>>, vector<8x1x32xf32>
    %2 = vector.broadcast %1 : vector<8x1x32xf32> to vector<8x2x32xf32>
    %3 = arith.addf %0, %2 : vector<8x2x32xf32>
    %c0_5 = arith.constant 0 : index
    %c0_6 = arith.constant 0 : index
    %c0_7 = arith.constant 0 : index
    %4 = vector.load %arg3[%c0_5, %c0_6, %c0_7] : memref<8x2x32xf32, #tpu.memory_space<vmem>>, vector<8x2x32xf32>
    tpu.vector_store %arg3[%c0_5, %c0_6, %c0_7], %3 {strides = array<i32>} : memref<8x2x32xf32, #tpu.memory_space<vmem>>, vector<8x2x32xf32>,
    return
  }
  func.func @transform_0(%arg0: i32) -> (i32, i32, i32) {
    %c0_i32 = arith.constant 0 : i32
    %c0_i32_0 = arith.constant 0 : i32
    %c0_i32_1 = arith.constant 0 : i32
    return %arg0, %c0_i32, %c0_i32_0 : i32, i32, i32
  }
  func.func @transform_1(%arg0: i32) -> (i32, i32, i32) {
    %c0_i32 = arith.constant 0 : i32
    %c0_i32_0 = arith.constant 0 : i32
    %c0_i32_1 = arith.constant 0 : i32
    return %arg0, %c0_i32, %c0_i32_0 : i32, i32, i32
  }
  func.func @transform_2(%arg0: i32) -> (i32, i32, i32) {
    %c0_i32 = arith.constant 0 : i32
    %c0_i32_0 = arith.constant 0 : i32
    %c0_i32_1 = arith.constant 0 : i32
    return %arg0, %c0_i32, %c0_i32_0 : i32, i32, i32
  }
}

</mosaic_0001>

<bundles_post_ra>
// kernel: tpu_custom_call.1
= control target key start
LH: loop header
LB: loop body
LE: loop exit
PB: predicated region body
PF: predicated region fallthrough
CT: control target
= control target key end

     0   :  { %vm60_vm0 = vcmask 254976   ;;  %s201_s0 = inlined_call_operand.vmem [shape: f32[8,2,32], index: 0, kind: input, shape index: {}]   ;;  %s202_s1 = inlined_call_operand.vmem [shape: f32[64,1,32], index: 1, kind: input, shape index: {}]   ;;  %s203_s2 = inlined_call_operand.hbm [shape: f32[8,2,32], index: 2, kind: output, shape index: {}]  }
   0x1   :  { %v12_v0 = vld [vmem:[%s201_s0] sm:$0x3]  ;;  %v13_v2 = vld [vmem:[%s201_s0 + $0x2] sm:$0x3]  ;;  %v14_v5 = vld [vmem:[%s201_s0 + $0x4] sm:$0x3] }
   0x2   :  { %v90_v1 = vld [vmem:[%s202_s1] ss:$0 sm:$0xff]  ;;  %v91_v4 = vld [vmem:[%s202_s1 + $0x1] ss:$0 sm:$0xff]  ;;  %v92_v6 = vld [vmem:[%s202_s1 + $0x2] ss:$0 sm:$0xff] }
   0x3   :  { %v52_v3 = vadd.f32 %v90_v1, %v12_v0  ;;  %v15_v7 = vld [vmem:[%s201_s0 + $0x6] sm:$0x3]  ;;  %v53_v8 = vadd.f32 %v91_v4, %v13_v2  ;;  %v93_v9 = vld [vmem:[%s202_s1 + $0x3] ss:$0 sm:$0xff]  ;;  %v16_v10 = vld [vmem:[%s201_s0 + $0x8] sm:$0x3]  ;;  %v54_v11 = vadd.f32 %v92_v6, %v14_v5 }
   0x4   :  { %v94_v12 = vld [vmem:[%s202_s1 + $0x4] ss:$0 sm:$0xff]  ;;  %v17_v13 = vld [vmem:[%s201_s0 + $0xa] sm:$0x3]  ;;  %v55_v14 = vadd.f32 %v93_v9, %v15_v7  ;;  %v95_v15 = vld [vmem:[%s202_s1 + $0x5] ss:$0 sm:$0xff] }
   0x5   :  { %61 = vst.msk [vmem:[#allocation2] sm:$0x3] %vm60_vm0, %v52_v3  ;;  %v56_v16 = vadd.f32 %v94_v12, %v16_v10  ;;  %v18_v17 = vld [vmem:[%s201_s0 + $0xc] sm:$0x3]  ;;  %v57_v18 = vadd.f32 %v95_v15, %v17_v13  ;;  %v96_v19 = vld [vmem:[%s202_s1 + $0x6] ss:$0 sm:$0xff] }
   0x6   :  { %62 = vst.msk [vmem:[#allocation2 + $0x2] sm:$0x3] %vm60_vm0, %v53_v8  ;;  %v19_v20 = vld [vmem:[%s201_s0 + $0xe] sm:$0x3]  ;;  %v97_v21 = vld [vmem:[%s202_s1 + $0x7] ss:$0 sm:$0xff]  ;;  %v58_v22 = vadd.f32 %v96_v19, %v18_v17 }
   0x7   :  { %63 = vst.msk [vmem:[#allocation2 + $0x4] sm:$0x3] %vm60_vm0, %v54_v11 }
   0x8   :  { %64 = vst.msk [vmem:[#allocation2 + $0x6] sm:$0x3] %vm60_vm0, %v55_v14 }
   0x9   :  { %65 = vst.msk [vmem:[#allocation2 + $0x8] sm:$0x3] %vm60_vm0, %v56_v16 }
   0xa   :  { %66 = vst.msk [vmem:[#allocation2 + $0xa] sm:$0x3] %vm60_vm0, %v57_v18 }
   0xb   :  { %7 = vsyncpa [#allocation3], 0  ;;  %s124_s13 = smov [#allocation2]   ;;  %s75_s17 = sshll.u32 %s203_s2, 4  ;;  %v59_v23 = vadd.f32 %v97_v21, %v19_v20  ;;  %67 = vst.msk [vmem:[#allocation2 + $0xc] sm:$0x3] %vm60_vm0, %v58_v22  ;;  %s76_s17 = int_to_ptr.hbm [resolvable:$true] %s75_s17 }
   0xc   :  { %s73_s14 = sshll.u32 %s124_s13, 4  ;;  %s125_s0 = smov 32   ;;  %s74_s14 = int_to_ptr.vmem [resolvable:$true] %s73_s14 }
   0xd   :  { %68 = vst.msk [vmem:[#allocation2 + $0xe] sm:$0x3] %vm60_vm0, %v59_v23  ;;  %s126_s18 = smov 2  }
   0xe   :  { %81 = dma.vmem_to_hbm [thread:$0]  %s74_s14, 256, %s76_s17, [#allocation3], %s125_s0, %s125_s0, %s126_s18  }
   0xf   :  { %122 = dma.done.wait [#allocation3], 256  }
  0x10   :  { %123 = vsyncadd [#allocation3], 4294967040 }
  0x11   :  { %86 = vsyncpa [#allocation3], 1 }

</bundles_post_ra>
